<compile_context>
chip_gen: v5e
topology: v5e:2x2
jax: 0.10.0
libtpu: 0.0.40
codegen_flags: <defaults>
</compile_context>

<pallas_src>
import functools

import jax
import jax.numpy as jnp
from jax import lax
from jax.experimental import pallas as pl
from jax.experimental.pallas import tpu as pltpu


def _round_up(x: int, m: int) -> int:
    return ((x + m - 1) // m) * m


def _round_down(x: int, m: int) -> int:
    return (x // m) * m


def _pretext_partial_kernel(t_ref, l_ref, out_ref, *,
                            B, T, tile_b, tile_t, mask_b, mask_t):
    """Per-block partial sum of (t - l)^2 written into a full (8,128) out tile."""
    t = t_ref[...].astype(jnp.float32)
    l = l_ref[...].astype(jnp.float32)
    d = t - l
    sq = d * d

    def _store(block_sq):
        # Mosaic lowers the full-block sum as vreg-wise VPU accumulation plus a
        # single final cross-lane/sublane reduce — one XLU reduce per block.
        partial = jnp.sum(block_sq)
        r = lax.broadcasted_iota(jnp.int32, out_ref.shape, 0)
        c = lax.broadcasted_iota(jnp.int32, out_ref.shape, 1)
        out_ref[...] = jnp.where(jnp.logical_and(r == 0, c == 0),
                                 partial, jnp.float32(0.0))

    if not (mask_b or mask_t):
        _store(sq)
        return

    i = pl.program_id(0)
    j = pl.program_id(1)

    is_edge = None
    if mask_b:
        is_edge = i == pl.num_programs(0) - 1
    if mask_t:
        e_t = j == pl.num_programs(1) - 1
        is_edge = e_t if is_edge is None else jnp.logical_or(is_edge, e_t)

    # Interior blocks: unmasked hot path (no iota / compare / select).
    @pl.when(jnp.logical_not(is_edge))
    def _():
        _store(sq)

    # Edge blocks only: mask the out-of-bounds tail rows / cols.
    @pl.when(is_edge)
    def _():
        keep = None
        if mask_b:
            rows = lax.broadcasted_iota(jnp.int32, sq.shape, 0) + i * tile_b
            keep = rows < B
        if mask_t:
            cols = lax.broadcasted_iota(jnp.int32, sq.shape, 1) + j * tile_t
            kc = cols < T
            keep = kc if keep is None else jnp.logical_and(keep, kc)
        _store(jnp.where(keep, sq, jnp.float32(0.0)))


def avarage_pretext_loss(targets: jax.Array, labels: jax.Array,
                         coefficients: jax.Array | None = None,
                         *, target_block_bytes: int = 4 << 20) -> jax.Array:
    """Pallas equivalent of AvaragePretextLoss.forward with an MSE criterion.

    targets, labels: (B, T) arrays (f32 or bf16).  Returns a scalar f32 loss.
    """
    del coefficients  # module parameter, unused in the reference forward()
    assert targets.shape == labels.shape and targets.ndim == 2
    B, T = targets.shape

    itemsize = jnp.dtype(targets.dtype).itemsize
    # Sublane packing granularity per dtype width (f32->8, bf16->16, int8->32).
    sub = {4: 8, 2: 16, 1: 32}.get(itemsize, 8)

    # Per-block element budget in f32-equivalent elements (bounds both the
    # input DMA blocks and the in-kernel f32 intermediates).
    budget = max(sub * 128, target_block_bytes // 4)

    # ---- T axis: full width when it fits, else 128-multiple tiles. ----
    if T * sub <= budget:
        tile_t = T
    else:
        tile_t = max(128, _round_down(budget // sub, 128))
        tile_t = min(tile_t, _round_up(T, 128))
        if tile_t >= T:
            tile_t = T
    grid_t = pl.cdiv(T, tile_t)
    mask_t = (T % tile_t) != 0

    # ---- B axis: dtype-aware sublane-rounded row tiles from the budget. ----
    if B <= sub:
        tile_b = B  # full extent (allowed even when < 8)
    else:
        rows_budget = max(sub, _round_down(budget // tile_t, sub))
        tile_b = min(rows_budget, _round_up(B, sub))
    grid_b = pl.cdiv(B, tile_b)

    # v7x megacore: keep >= 2 grid steps whenever the batch can be split so
    # both TensorCores get work (harmless on single-TC v5e/v6e).
    if grid_b * grid_t == 1 and B > sub:
        tile_b = min(tile_b, _round_up(pl.cdiv(B, 2), sub))
        grid_b = pl.cdiv(B, tile_b)
    mask_b = (B % tile_b) != 0

    kernel = functools.partial(
        _pretext_partial_kernel,
        B=B, T=T, tile_b=tile_b, tile_t=tile_t, mask_b=mask_b, mask_t=mask_t,
    )

    out_rows = grid_b * grid_t * 8
    cost = pl.CostEstimate(
        flops=3 * B * T,
        transcendentals=0,
        bytes_accessed=2 * B * T * itemsize + out_rows * 128 * 4,
    )

    partials = pl.pallas_call(
        kernel,
        out_shape=jax.ShapeDtypeStruct((out_rows, 128), jnp.float32),
        grid_spec=pltpu.PrefetchScalarGridSpec(
            num_scalar_prefetch=0,
            grid=(grid_b, grid_t),
            in_specs=[
                pl.BlockSpec((tile_b, tile_t), lambda i, j: (i, j)),
                pl.BlockSpec((tile_b, tile_t), lambda i, j: (i, j)),
            ],
            # Each grid step owns its own full (8,128) vreg tile -> unmasked vst.
            out_specs=pl.BlockSpec((8, 128), lambda i, j: (i * grid_t + j, 0)),
        ),
        compiler_params=pltpu.CompilerParams(
            # Independent per-block partials: fully parallel grid.
            dimension_semantics=("parallel", "parallel"),
            # 2 inputs x 2 pipeline bufs + f32 intermediates stay well under
            # this; above the 16/32 MiB scoped defaults, under v7x's 64 MiB.
            vmem_limit_bytes=48 << 20,
        ),
        cost_estimate=cost,
    )(targets, labels)

    total = jnp.sum(partials, dtype=jnp.float32)
    return (total / jnp.float32(B * T)).astype(jnp.float32)


if __name__ == "__main__":
    key = jax.random.PRNGKey(0)
    k_t, k_l = jax.random.split(key)

    # 1) Small aligned f32 case (two grid steps, no masking).
    B, T = 16, 128
    targets = jax.random.normal(k_t, (B, T), dtype=jnp.float32)
    labels = jax.random.normal(k_l, (B, T), dtype=jnp.float32)
    coefficients = jnp.ones((B,), dtype=jnp.float32)  # unused in forward()

    loss = avarage_pretext_loss(targets, labels, coefficients)
    jax.block_until_ready(loss)
    ref = jnp.sum((targets - labels) ** 2) / (B * T)
    assert jnp.allclose(loss, ref, rtol=1e-6, atol=1e-6), (loss, ref)

    # 2) Non-divisible batch (exercises the gated masked-tail path).
    B2, T2 = 50, 256
    t2 = jax.random.normal(k_t, (B2, T2), dtype=jnp.float32)
    l2 = jax.random.normal(k_l, (B2, T2), dtype=jnp.float32)
    loss2 = avarage_pretext_loss(t2, l2)
    jax.block_until_ready(loss2)
    ref2 = jnp.sum((t2 - l2) ** 2) / (B2 * T2)
    assert jnp.allclose(loss2, ref2, rtol=1e-6, atol=1e-6), (loss2, ref2)

    # 3) bf16 inputs (16-row sublane packing, f32 accumulation in-kernel).
    t3 = t2.astype(jnp.bfloat16)
    l3 = l2.astype(jnp.bfloat16)
    loss3 = avarage_pretext_loss(t3, l3)
    jax.block_until_ready(loss3)
    ref3 = jnp.sum((t3.astype(jnp.float32) - l3.astype(jnp.float32)) ** 2) / (B2 * T2)
    assert jnp.allclose(loss3, ref3, rtol=1e-5, atol=1e-5), (loss3, ref3)

    # 4) Forced T-tiling with both B- and T-tail masks (tiny block budget).
    B4, T4 = 10, 300
    t4 = jax.random.normal(k_t, (B4, T4), dtype=jnp.float32)
    l4 = jax.random.normal(k_l, (B4, T4), dtype=jnp.float32)
    loss4 = avarage_pretext_loss(t4, l4, target_block_bytes=8192)
    jax.block_until_ready(loss4)
    ref4 = jnp.sum((t4 - l4) ** 2) / (B4 * T4)
    assert jnp.allclose(loss4, ref4, rtol=1e-6, atol=1e-6), (loss4, ref4)

    print("KERNEL_OK")
</pallas_src>

<mosaic_0001>
module attributes {stable_mosaic.version = 11 : i64} {
  func.func @_pretext_partial_kernel(%arg0: i32, %arg1: i32, %arg2: memref<8x128xf32, #tpu.memory_space<vmem>>, %arg3: memref<8x128xf32, #tpu.memory_space<vmem>>, %arg4: memref<8x128xf32, #tpu.memory_space<vmem>>) attributes {dimension_semantics = [#tpu.dimension_semantics<parallel>, #tpu.dimension_semantics<parallel>], iteration_bounds = array<i64: 2, 1>, scalar_prefetch = 0 : i64, scratch_operands = 0 : i64, tpu.core_type = #tpu.core_type<tc>, window_params = [{transform_indices = @transform_0, window_bounds = array<i64: 8, 128>}, {transform_indices = @transform_1, window_bounds = array<i64: 8, 128>}, {transform_indices = @transform_2, window_bounds = array<i64: 8, 128>}]} {
    %c0 = arith.constant 0 : index
    %c0_0 = arith.constant 0 : index
    %0 = vector.load %arg2[%c0, %c0_0] : memref<8x128xf32, #tpu.memory_space<vmem>>, vector<8x128xf32>
    %c0_1 = arith.constant 0 : index
    %c0_2 = arith.constant 0 : index
    %1 = vector.load %arg3[%c0_1, %c0_2] : memref<8x128xf32, #tpu.memory_space<vmem>>, vector<8x128xf32>
    %2 = arith.subf %0, %1 : vector<8x128xf32>
    %3 = arith.mulf %2, %2 : vector<8x128xf32>
    %4 = vector.shape_cast %3 : vector<8x128xf32> to vector<1x8x128xf32>
    %cst = arith.constant dense<0.000000e+00> : vector<1xf32>
    %5 = vector.multi_reduction <add>, %4, %cst [1, 2] : vector<1x8x128xf32> to vector<1xf32>
    %6 = vector.shape_cast %5 : vector<1xf32> to vector<1x1x1xf32>
    %7 = vector.extract %6[0, 0, 0] : f32 from vector<1x1x1xf32>
    %8 = tpu.iota {dimensions = array<i32: 0>} : vector<8x128xi32>
    %9 = tpu.iota {dimensions = array<i32: 1>} : vector<8x128xi32>
    %c0_i32 = arith.constant 0 : i32
    %10 = vector.broadcast %c0_i32 : i32 to vector<8x128xi32>
    %11 = arith.cmpi eq, %8, %10 : vector<8x128xi32>
    %c0_i32_3 = arith.constant 0 : i32
    %12 = vector.broadcast %c0_i32_3 : i32 to vector<8x128xi32>
    %13 = arith.cmpi eq, %9, %12 : vector<8x128xi32>
    %14 = arith.andi %11, %13 : vector<8x128xi1>
    %cst_4 = arith.constant 0.000000e+00 : f32
    %15 = vector.broadcast %7 : f32 to vector<8x128xf32>
    %16 = vector.broadcast %cst_4 : f32 to vector<8x128xf32>
    %17 = arith.select %14, %15, %16 : vector<8x128xi1>, vector<8x128xf32>
    %c0_5 = arith.constant 0 : index
    %c0_6 = arith.constant 0 : index
    %18 = vector.load %arg4[%c0_5, %c0_6] : memref<8x128xf32, #tpu.memory_space<vmem>>, vector<8x128xf32>
    tpu.vector_store %arg4[%c0_5, %c0_6], %17 {strides = array<i32>} : memref<8x128xf32, #tpu.memory_space<vmem>>, vector<8x128xf32>,
    return
  }
  func.func @transform_0(%arg0: i32, %arg1: i32) -> (i32, i32) {
    %c0_i32 = arith.constant 0 : i32
    return %arg0, %arg1 : i32, i32
  }
  func.func @transform_1(%arg0: i32, %arg1: i32) -> (i32, i32) {
    %c0_i32 = arith.constant 0 : i32
    return %arg0, %arg1 : i32, i32
  }
  func.func @transform_2(%arg0: i32, %arg1: i32) -> (i32, i32) {
    %c1_i32 = arith.constant 1 : i32
    %0 = arith.muli %arg0, %c1_i32 : i32
    %1 = arith.addi %0, %arg1 : i32
    %c0_i32 = arith.constant 0 : i32
    %c0_i32_0 = arith.constant 0 : i32
    return %1, %c0_i32 : i32, i32
  }
}

</mosaic_0001>

<bundles_post_ra>
// kernel: tpu_custom_call.1
= control target key start
LH: loop header
LB: loop body
LE: loop exit
PB: predicated region body
PF: predicated region fallthrough
CT: control target
= control target key end

     0   :  { %7 = vsyncpa [#allocation3], 0  ;;  %s746_s0 = inlined_call_operand.hbm [shape: f32[16,128], index: 0, kind: input, shape index: {}]   ;;  %s747_s1 = inlined_call_operand.hbm [shape: f32[16,128], index: 1, kind: input, shape index: {}]   ;;  %s748_s2 = inlined_call_operand.hbm [shape: f32[16,128], index: 2, kind: output, shape index: {}]  }
   0x1   :  { %9 = vsyncpa [#allocation3 + $0x1], 0 }
   0x2   :  { %10 = vsyncpa [#allocation6], 0 }
   0x3   :  { %12 = vsyncpa [#allocation6 + $0x1], 0 }
   0x4   :  { %13 = vsyncpa [#allocation4], 0 }
   0x5   :  { %15 = vsyncpa [#allocation4 + $0x1], 0  ;;  %s613_s9 = smov 0   ;;  %s615_s10 = smov 0  }
   0x6   :  { %s617_s11 = smov 0   ;;  %s619_s12 = smov 0  }
   0x7   :  { %s621_s13 = smov 0   ;;  %s623_s14 = smov 0  }
   0x8 LB: > { %s365_s15 = sadd.s32 4294967295, %s596_s14   ;;  %s366_s16 = sadd.s32 4294967294, %s596_s14   ;;  %s596_s14 = sphi %s623_s14, %s21_s14   ;;  %s592_s13 = sphi %s621_s13, %s757_s13   ;;  %s588_s12 = sphi %s619_s12, %s756_s12   ;;  %s584_s11 = sphi %s617_s11, %s755_s11   ;;  %s580_s10 = sphi %s615_s10, %s754_s10   ;;  %s576_s9 = sphi %s613_s9, %s753_s9  }
   0x9   : > { %s33_s17 = sadd.s32 1, %s592_s13  ;;  %s42_s18 = sadd.s32 1, %s584_s11 }
   0xa   : > { %p35_p0 = scmp.ge.s32.totalorder %s33_s17, 2  ;;  %p49_p1 = scmp.ne.s32.totalorder %s584_s11, %s580_s10 }
   0xb   : > { %p50_p2 = scmp.eq.s32.totalorder %s596_s14, 0  ;;  %p55_p3 = scmp.ne.s32.totalorder %s580_s10, %s576_s9 }
   0xc   : > { %s759_s17 = smov (%p35_p0, %s33_s17), 0  ;;  %p56_p5 = scmp.eq.s32.totalorder %s365_s15, 0 }
   0xd   : > { %p654_p4 = por %p50_p2, %p49_p1  ;;  %s37_s20 = ssub.s32 %s592_s13, %s759_s17 }
   0xe   : > { %p109_p6 = scmp.eq.s32.totalorder %s365_s15, 1  ;;  %p40_p7 = scmp.eq.s32.totalorder %s37_s20, 0 }
   0xf   : > { %p660_p8 = por %p56_p5, %p55_p3  ;;  %p115_p10 = scmp.eq.s32.totalorder %s366_s16, 1 }
  0x10   : > { %p664_p9 = por %p109_p6, %p49_p1  ;;  %p368_p12 = scmp.ge.s32.totalorder %s596_s14, 2 }
  0x11   : > { %s669_s23 = scalar_select %p40_p7, %s584_s11, %s42_s18  }
  0x12   : > { %p671_p11 = por %p115_p10, %p55_p3  ;;  %p400_p13 = scmp.lt.s32.totalorder %s596_s14, 2 }
  0x13   : > { %s135_s25 = sand.u32 1, %s584_s11   ;;  %s370_s27 = sshll.u32 %s592_s13, 3 }
  0x14   : > { %s369_s26 = sshll.u32 %s135_s25, 3  ;;  %s144_s30 = scalar_lea.hbm %s746_s0, %s370_s27 }
  0x15   : > { %s139_s3 = scalar_lea.vmem [#allocation2], %s369_s26  ;;  %s146_s5 = sshll.u32 %s144_s30, 4  ;;  %s147_s5 = int_to_ptr.hbm [resolvable:$true] %s146_s5 }
  0x16   : > { %s148_s4 = sshll.u32 %s139_s3, 4  ;;  %p390_p0 = pnand %p400_p13, %p654_p4  ;;  %s149_s4 = int_to_ptr.vmem [resolvable:$true] %s148_s4 }
  0x17   : > { %p373_p1 = scmp.ge.s32.totalorder %s596_s14, 1  ;;  %p173_p2 = scmp.lt.s32.totalorder %s596_s14, 3 }
  0x18   : > { %s136_s6 = scalar_lea.sflag [#allocation3], %s135_s25  ;;  %s164_s15 = scalar_lea.hbm %s747_s1, %s370_s27 }
  0x19   : > { %392 = dma.hbm_to_vmem [thread:$0]  (!%p390_p0), %s147_s5, 128, %s149_s4, %s136_s6  }
  0x1a   : > { %p174_p3 = pnand %p373_p1, %p173_p2  ;;  %s159_s16 = scalar_lea.vmem [#allocation5], %s369_s26 }
  0x1b   : > { %s168_s18 = sshll.u32 %s159_s16, 4  ;;  %s166_s20 = sshll.u32 %s164_s15, 4  ;;  %s169_s18 = int_to_ptr.vmem [resolvable:$true] %s168_s18  ;;  %s167_s20 = int_to_ptr.hbm [resolvable:$true] %s166_s20 }
  0x1c   : > { %s156_s28 = scalar_lea.sflag [#allocation6], %s135_s25  ;;  %177 = sbr.rel (%p174_p3) target bundleno = 224 (0xe0), region = 28 }
  0x1d   : > { %395 = dma.hbm_to_vmem [thread:$0]  (!%p390_p0), %s167_s20, 128, %s169_s18, %s156_s28  }
  0x1e   : > { %s690_s19 = sand.u32 (!%p174_p3), 1, %s580_s10  }
  0x1f   : > { %s693_s29 = sshll.u32 (!%p174_p3), %s690_s19, 3  ;;  %s180_s30 = scalar_lea.sflag (!%p174_p3), [#allocation3], %s690_s19 }
  0x20   : > { %s183_s3 = scalar_lea.vmem (!%p174_p3), [#allocation2], %s693_s29 }
  0x21   : > { %563 = dma.done.wait (%p660_p8), %s180_s30, 128  }
  0x22   : > { %565 = vsyncadd (%p660_p8), %s180_s30, 4294967168  ;;  %s190_s25 = scalar_lea.sflag [#allocation6], %s690_s19  ;;  %s193_s26 = scalar_lea.vmem [#allocation5], %s693_s29 }
  0x23   : > { %567 = dma.done.wait (%p660_p8), %s190_s25, 128  }
  0x24   : > { %569 = vsyncadd (%p660_p8), %s190_s25, 4294967168  ;;  %v221_v0 = vld [vmem:[%s183_s3] sm:$0xff]  ;;  %v222_v1 = vld [vmem:[%s193_s26] sm:$0xff]  ;;  %v234_v11 = vlaneseq  ;;  %s378_s21 = sshll.u32 %s588_s12, 3  ;;  %s219_s6 = scalar_lea.vmem [#allocation7], %s693_s29 }
  0x25   : > { %v223_v2 = vsub.f32 %v221_v0, %v222_v1  ;;  %s256_s5 = scalar_lea.hbm %s748_s2, %s378_s21  ;;  %s258_s7 = sshll.u32 %s219_s6, 4  ;;  %s259_s7 = int_to_ptr.vmem [resolvable:$true] %s258_s7 }
  0x26   : > { %v235_v12 = vshrl.u32 %v234_v11, 7  ;;  %v237_v13 = vand.u32 127, %v234_v11  ;;  %s260_s8 = sshll.u32 %s256_s5, 4  ;;  %s245_s16 = scalar_lea.sflag [#allocation4], %s690_s19  ;;  %s261_s8 = int_to_ptr.hbm [resolvable:$true] %s260_s8 }
  0x27   : > { %v224_v3 = vmul.f32 %v223_v2, %v223_v2  ;;  %s524_s18 = sshra.s32 %s261_s8, 4  ;;  %s530_s29 = scalar_lea.hbm %s748_s2, 16  ;;  %s525_s18 = int_to_ptr.hbm [resolvable:$true] %s524_s18 }
  0x28   : > { %vm238_vm0 = vcmp.eq.s32.totalorder %v235_v12, 0  ;;  %vm239_vm1 = vcmp.eq.s32.totalorder %v237_v13, 0  ;;  %s526_s12 = scalar_lea.hbm %s525_s18, 8  ;;  %p531_p7 = scmp.lt.s32.totalorder %s525_s18, %s748_s2 }
  0x29   : > { %225 = vadd.xlane.f32.xlu0 %v224_v3  ;;  %vm240_vm2 = vmand %vm238_vm0, %vm239_vm1  ;;  %p527_p4 = scmp.ne.s32.totalorder %s525_s18, %s526_s12  ;;  %p532_p8 = scmp.lt.s32.totalorder %s530_s29, %s526_s12 }
  0x2b   : > { %p528_p5 = pnand %p527_p4, %p664_p9  ;;  %p533_p10 = por %p532_p8, %p531_p7 }
  0x2d   : > { %p529_p6 = pneg %p528_p5 }
  0x2f   : > { %p534_p13 = pnand %p533_p10, %p529_p6 }
  0x9c   : > { %v226_v4 = vpop.xlane.xlu0 %225 }
  0x9d   : > { %v227_v5 = vrot.slane %v226_v4, 4 }
  0x9f   : > { %v228_v6 = vadd.f32 %v227_v5, %v226_v4 }
  0xa1   : > { %v229_v7 = vrot.slane %v228_v6, 2 }
  0xa3   : > { %v230_v8 = vadd.f32 %v229_v7, %v228_v6 }
  0xa5   : > { %v231_v9 = vrot.slane %v230_v8, 1 }
  0xa7   : > { %v232_v10 = vadd.f32 %v231_v9, %v230_v8 }
  0xa9   : > { %381 = vpush %v232_v10 }
  0xda   : > { %s382_s15 = spop %381 }
  0xdb   : > { %v241_v14 = vstv %s382_s15 }
  0xdc   : > { %v242_v15 = vsel %vm240_vm2, %v241_v14, 0.0 }
  0xdd   : > { %243 = vst [vmem:[%s219_s6] sm:$0xff] %v242_v15 }
  0xde   : > { %537 = shalt.err (!%p534_p13)
}
  0xdf   : > { %387 = dma.vmem_to_hbm [thread:$0]  (%p664_p9), %s259_s7, 128, %s261_s8, %s245_s16  }
  0xe0 PF: > { %s272_s19 = sand.u32 1, %s576_s9   ;;  %p397_p0 = pnand %p368_p12, %p671_p11 }
  0xe1   : > { %s273_s25 = scalar_lea.sflag [#allocation4], %s272_s19 }
  0xe2   : > { %p398_p1 = pneg %p397_p0 }
  0xe4   : > { %571 = dma.done.wait (%p398_p1), %s273_s25, 128  }
  0xe5   : > { %573 = vsyncadd (%p398_p1), %s273_s25, 4294967168  ;;  %s21_s14 = sadd.s32 1, %s596_s14   ;;  %s753_s9 = smov %s580_s10 }
  0xe6   : > { %p18_p2 = scmp.ge.s32.totalorder %s21_s14, 4   ;;  %s754_s10 = smov %s584_s11 }
  0xe7   : > { %s755_s11 = smov %s669_s23  ;;  %s756_s12 = smov %s592_s13 }
  0xe8   : > { %s757_s13 = smov %s759_s17  ;;  %20 = sbr.rel (!%p18_p2) target bundleno = 8 (0x8), region = 86 }
  0xed   :  { %279 = vsyncpa [#allocation3], 1 }
  0xee   :  { %281 = vsyncpa [#allocation3 + $0x1], 1 }
  0xef   :  { %282 = vsyncpa [#allocation6], 1 }
  0xf0   :  { %284 = vsyncpa [#allocation6 + $0x1], 1 }
  0xf1   :  { %285 = vsyncpa [#allocation4], 1 }
  0xf2   :  { %287 = vsyncpa [#allocation4 + $0x1], 1 }

</bundles_post_ra>
